<compile_context>
chip_gen: v6e
topology: v6e:2x2x1
jax: 0.10.0
libtpu: 0.0.40
codegen_flags: <defaults>
</compile_context>

<pallas_src>
import jax
import jax.numpy as jnp
from jax.experimental import pallas as pl
from jax.experimental.pallas import tpu as pltpu


def _linear_relu_kernel(x_ref, w_ref, b_ref, o_ref):
    """o = relu(x @ w + b).  x: (M, K), w: (K, N), b: (1, N), o: (M, N)."""
    y = jnp.dot(x_ref[...], w_ref[...], preferred_element_type=jnp.float32)
    o_ref[...] = jnp.maximum(y + b_ref[...], 0.0)


def _round_up(x, m):
    return (x + m - 1) // m * m


def _gridless_call(x, w, b2):
    """Single block, no grid / pipeline machinery: whole operands in VMEM."""
    M = x.shape[0]
    N = w.shape[1]
    return pl.pallas_call(
        _linear_relu_kernel,
        out_shape=jax.ShapeDtypeStruct((M, N), jnp.float32),
        in_specs=[
            pl.BlockSpec(memory_space=pltpu.MemorySpace.VMEM),
            pl.BlockSpec(memory_space=pltpu.MemorySpace.VMEM),
            pl.BlockSpec(memory_space=pltpu.MemorySpace.VMEM),
        ],
        out_specs=pl.BlockSpec(memory_space=pltpu.MemorySpace.VMEM),
    )(x, w, b2)


def _tiled_call(x, w, b2, tile_m):
    """Batch-tiled grid; weight/bias VMEM-resident; batch axis 'parallel'."""
    M, K = x.shape
    N = w.shape[1]
    num_tiles = pl.cdiv(M, tile_m)
    # v7x has two TensorCores; prefer an even tile count so "parallel" batch
    # sharding keeps both busy (measured no-op on single-TC v5e/v6e).
    if num_tiles > 1 and num_tiles % 2 == 1:
        alt = _round_up(pl.cdiv(M, num_tiles + 1), 8)
        if pl.cdiv(M, alt) % 2 == 0:
            tile_m = alt
            num_tiles = pl.cdiv(M, alt)

    cost = pl.CostEstimate(
        flops=2 * M * K * N,
        transcendentals=0,
        bytes_accessed=4 * (M * K + M * N + K * N + N),
    )
    return pl.pallas_call(
        _linear_relu_kernel,
        out_shape=jax.ShapeDtypeStruct((M, N), jnp.float32),
        grid_spec=pl.GridSpec(
            grid=(num_tiles,),
            in_specs=[
                pl.BlockSpec((tile_m, K), lambda i: (i, 0)),
                pl.BlockSpec((K, N), lambda i: (0, 0)),   # weight stays resident
                pl.BlockSpec((1, N), lambda i: (0, 0)),   # bias stays resident
            ],
            out_specs=pl.BlockSpec((tile_m, N), lambda i: (i, 0)),
        ),
        compiler_params=pltpu.CompilerParams(
            dimension_semantics=("parallel",),
        ),
        cost_estimate=cost,
    )(x, w, b2)


def dqn_forward(state, weight, bias, *, batch_tile=8192, vmem_budget_bytes=24 << 20):
    """relu(state @ weight.T + bias), matching PyTorch DQN.forward.

    state:  (B, S) float32
    weight: (A, S) float32  (PyTorch nn.Linear layout)
    bias:   (A,)   float32
    """
    state = state.astype(jnp.float32)
    B, S = state.shape
    A = weight.shape[0]
    wT = weight.astype(jnp.float32).T          # (S, A): canonical [K, N] for the MXU
    bias = bias.astype(jnp.float32)

    # Row-pack factor: largest power of two (<= 8) with P*A <= 128 lanes.
    P = 1
    while P < 8 and A * (2 * P) <= 128:
        P *= 2

    if P > 1:
        w_mat = jnp.kron(jnp.eye(P, dtype=jnp.float32), wT)   # (P*S, P*A) block-diag
        b_mat = jnp.tile(bias, (P,)).reshape(1, P * A)
    else:
        w_mat = wT
        b_mat = bias.reshape(1, A)

    B_main = (B // P) * P
    G = B_main // P                                            # packed rows in main path

    # Packed-row tile: as big as the VMEM budget allows (per-grid-step overhead
    # ~0.35us makes small tiles overhead-bound), kept under v7x's scoped VMEM.
    row_bytes = 4 * (P * S + P * A) * 2                        # x + out, double-buffered
    resident_bytes = 4 * (P * S * P * A + P * A)               # weight + bias
    tile_g = max(
        8,
        min((batch_tile // P) // 8 * 8,
            (vmem_budget_bytes - resident_bytes) // max(row_bytes, 1) // 8 * 8),
    )

    outs = []
    if G > 0:
        x_main = state if B_main == B else state[:B_main]      # contiguous prefix
        x_pack = x_main.reshape(G, P * S)                      # free row-major bitcast
        if G <= tile_g:
            y = _gridless_call(x_pack, w_mat, b_mat)
        else:
            y = _tiled_call(x_pack, w_mat, b_mat, tile_g)
        outs.append(y.reshape(B_main, A))                      # free bitcast back

    if B_main < B:
        # < P-row ragged tail: tiny single-block call (no full-input jnp.pad,
        # no out[:B] copy of the main output).
        y_tail = _gridless_call(state[B_main:], wT, bias.reshape(1, A))
        outs.append(y_tail)

    return outs[0] if len(outs) == 1 else jnp.concatenate(outs, axis=0)


if __name__ == "__main__":
    key = jax.random.PRNGKey(0)
    k1, k2, k3, k4 = jax.random.split(key, 4)

    state_dim = 32
    n_actions = 16

    # Deterministic synthetic parameters (mimic nn.Linear init scale 1/sqrt(fan_in)).
    bound = 1.0 / float(state_dim) ** 0.5
    weight = jax.random.uniform(k1, (n_actions, state_dim),
                                minval=-bound, maxval=bound, dtype=jnp.float32)
    bias = jax.random.uniform(k2, (n_actions,),
                              minval=-bound, maxval=bound, dtype=jnp.float32)

    def ref_fn(x):
        return jnp.maximum(x @ weight.T + bias, 0.0)

    # 1) Small batch: lane-dense packed, single-block (gridless) path.
    state_small = jax.random.normal(k3, (8, state_dim), dtype=jnp.float32)
    out_small = jax.block_until_ready(dqn_forward(state_small, weight, bias))
    assert out_small.shape == (8, n_actions)
    assert jnp.allclose(out_small, ref_fn(state_small), atol=1e-4, rtol=1e-4)

    # 2) Ragged batch: packed tiled grid (even tile count, ragged last block)
    #    plus a < 8-row tail handled by a tiny single-block call.
    state_big = jax.random.normal(k4, (1037, state_dim), dtype=jnp.float32)
    out_big = jax.block_until_ready(
        dqn_forward(state_big, weight, bias, batch_tile=256))
    assert out_big.shape == (1037, n_actions)
    assert jnp.allclose(out_big, ref_fn(state_big), atol=1e-4, rtol=1e-4)

    print("KERNEL_OK")
</pallas_src>

<mosaic_0001>
module attributes {stable_mosaic.version = 11 : i64} {
  func.func @_linear_relu_kernel(%arg0: memref<1x256xf32, #tpu.memory_space<vmem>>, %arg1: memref<256x128xf32, #tpu.memory_space<vmem>>, %arg2: memref<1x128xf32, #tpu.memory_space<vmem>>, %arg3: memref<1x128xf32, #tpu.memory_space<vmem>>) attributes {dimension_semantics = [], scalar_prefetch = 0 : i64, scratch_operands = 0 : i64, tpu.core_type = #tpu.core_type<tc>} {
    %c0 = arith.constant 0 : index
    %c0_0 = arith.constant 0 : index
    %0 = vector.load %arg0[%c0, %c0_0] : memref<1x256xf32, #tpu.memory_space<vmem>>, vector<1x256xf32>
    %c0_1 = arith.constant 0 : index
    %c0_2 = arith.constant 0 : index
    %1 = vector.load %arg1[%c0_1, %c0_2] : memref<256x128xf32, #tpu.memory_space<vmem>>, vector<256x128xf32>
    %cst = arith.constant dense<0.000000e+00> : vector<1x128xf32>
    %2 = tpu.matmul %0, %1, %cst {dimension_numbers = #tpu.dot_dimension_numbers<[1], [0], [0], [1], [0, 0, 1, 1], [], []>} : vector<1x256xf32>, vector<256x128xf32>, vector<1x128xf32> -> vector<1x128xf32>
    %c0_3 = arith.constant 0 : index
    %c0_4 = arith.constant 0 : index
    %3 = vector.load %arg2[%c0_3, %c0_4] : memref<1x128xf32, #tpu.memory_space<vmem>>, vector<1x128xf32>
    %4 = arith.addf %2, %3 : vector<1x128xf32>
    %cst_5 = arith.constant 0.000000e+00 : f32
    %5 = vector.broadcast %cst_5 : f32 to vector<1x128xf32>
    %6 = arith.maximumf %4, %5 : vector<1x128xf32>
    %c0_6 = arith.constant 0 : index
    %c0_7 = arith.constant 0 : index
    %7 = vector.load %arg3[%c0_6, %c0_7] : memref<1x128xf32, #tpu.memory_space<vmem>>, vector<1x128xf32>
    tpu.vector_store %arg3[%c0_6, %c0_7], %6 {strides = array<i32>} : memref<1x128xf32, #tpu.memory_space<vmem>>, vector<1x128xf32>,
    return
  }
}

</mosaic_0001>

<bundles_post_ra>
// kernel: tpu_custom_call.1
= control target key start
LH: loop header
LB: loop body
LE: loop exit
PB: predicated region body
PF: predicated region fallthrough
CT: control target
= control target key end

     0   :  { %8 = vsyncpa [#allocation3], 0  ;;  %s317_s0 = inlined_call_operand.hbm [shape: f32[1,256], index: 0, kind: input, shape index: {}]   ;;  %s318_s1 = inlined_call_operand.hbm [shape: f32[256,128], index: 1, kind: input, shape index: {}]   ;;  %s319_s2 = inlined_call_operand.vmem [shape: f32[1,128], index: 2, kind: input, shape index: {}]   ;;  %s320_s3 = inlined_call_operand.hbm [shape: f32[1,128], index: 3, kind: output, shape index: {}]  }
   0x1   :  { %9 = vsyncpa [#allocation6], 0 }
   0x2   :  { %10 = vsyncpa [#allocation4], 0  ;;  %s280_s12 = smov [#allocation2]   ;;  %s281_s14 = smov [#allocation5]  }
   0x3   :  { %s17_s13 = sshll.u32 %s280_s12, 4  ;;  %s26_s15 = sshll.u32 %s281_s14, 4  ;;  %s18_s13 = int_to_ptr.vmem [resolvable:$true] %s17_s13  ;;  %s27_s15 = int_to_ptr.vmem [resolvable:$true] %s26_s15 }
   0x4   :  { %s222_s16 = scalar_lea.vmem %s18_s13, 32  ;;  %p227_p1 = scmp.lt.s32.totalorder %s18_s13, %s18_s13 }
   0x5   :  { %p223_p0 = scmp.ne.s32.totalorder %s18_s13, %s222_s16  ;;  %p228_p2 = scmp.lt.s32.totalorder %s222_s16, %s222_s16 }
   0x7   :  { %p229_p3 = por %p228_p2, %p227_p1 }
   0x9   :  { %p230_p4 = pnand %p229_p3, %p223_p0 }
   0xb   :  { %233 = shalt.err (!%p230_p4)
}
   0xc   :  { %20 = dma.hbm_to_vmem [thread:$0]  %s317_s0, 32, %s18_s13, [#allocation3]  }
   0xd   :  { %s242_s19 = scalar_lea.vmem %s27_s15, 4096  ;;  %p247_p6 = scmp.lt.s32.totalorder %s27_s15, %s27_s15 }
   0xe   :  { %p243_p5 = scmp.ne.s32.totalorder %s27_s15, %s242_s19  ;;  %p248_p7 = scmp.lt.s32.totalorder %s242_s19, %s242_s19 }
  0x10   :  { %p249_p8 = por %p248_p7, %p247_p6 }
  0x12   :  { %p250_p9 = pnand %p249_p8, %p243_p5 }
  0x14   :  { %253 = shalt.err (!%p250_p9)
}
  0x15   :  { %s282_s20 = smov 128   ;;  %s283_s21 = smov 8  }
  0x16   :  { %32 = dma.hbm_to_vmem [thread:$0]  %s318_s1, 4096, %s27_s15, [#allocation6], %s282_s20, %s282_s20, %s283_s21  }
  0x17   :  { %274 = dma.done.wait [#allocation3], 32  }
  0x18   :  { %275 = vsyncadd [#allocation3], 4294967264 }
  0x19   :  { %276 = dma.done.wait [#allocation6], 4096  }
  0x1a   :  { %277 = vsyncadd [#allocation6], 4294963200  ;;  %v76_v0 = vlaneseq  ;;  %v73_v1 = vld [vmem:[#allocation5 + $0xf8] sm:$0xff]  ;;  %v72_v3 = vld [vmem:[#allocation5 + $0xf0] sm:$0xff]  ;;  %s284_s24 = smov [#allocation7]  }
  0x1b   :  { %v57_v2 = vld [vmem:[#allocation5 + $0x78] sm:$0xff]  ;;  %174 = vmatprep.subr.mxu0 %v73_v1  ;;  %v56_v4 = vld [vmem:[#allocation5 + $0x70] sm:$0xff]  ;;  %v71_v5 = vld [vmem:[#allocation5 + $0xe8] sm:$0xff]  ;;  %s164_s25 = sshll.u32 %s284_s24, 4  ;;  %s165_s25 = int_to_ptr.vmem [resolvable:$true] %s164_s25 }
  0x1c   :  { %175 = vmatpush3.msra.mxu0 %v57_v2  ;;  %v55_v6 = vld [vmem:[#allocation5 + $0x68] sm:$0xff]  ;;  %v77_v7 = vshrl.u32 %v76_v0, 7  ;;  %v70_v8 = vld [vmem:[#allocation5 + $0xe0] sm:$0xff]  ;;  %v69_v10 = vld [vmem:[#allocation5 + $0xd8] sm:$0xff]  ;;  %s254_s26 = scalar_lea.vmem %s165_s25, 16  ;;  %s258_s27 = scalar_lea.vmem %s165_s25, 32 }
  0x1d   :  { %176 = vmatprep.subr.mxu0 %v72_v3  ;;  %v54_v9 = vld [vmem:[#allocation5 + $0x60] sm:$0xff]  ;;  %v53_v11 = vld [vmem:[#allocation5 + $0x58] sm:$0xff]  ;;  %v68_v13 = vld [vmem:[#allocation5 + $0xd0] sm:$0xff]  ;;  %p255_p10 = scmp.ne.s32.totalorder %s165_s25, %s254_s26  ;;  %p259_p11 = scmp.lt.s32.totalorder %s165_s25, %s165_s25 }
  0x1e   :  { %177 = vmatpush3.msra.mxu0 %v56_v4  ;;  %v82_v12 = vsub.s32 1, %v77_v7  ;;  %v52_v14 = vld [vmem:[#allocation5 + $0x50] sm:$0xff]  ;;  %v67_v15 = vld [vmem:[#allocation5 + $0xc8] sm:$0xff]  ;;  %v41_v16 = vld [vmem:[#allocation2] sm:$0x3]  ;;  %v78_v33 = vsub.s32 0, %v77_v7  ;;  %p260_p12 = scmp.lt.s32.totalorder %s258_s27, %s254_s26 }
  0x1f   :  { %178 = vmatprep.subr.mxu0 %v71_v5  ;;  %v51_v17 = vld [vmem:[#allocation5 + $0x48] sm:$0xff]  ;;  %v66_v19 = vld [vmem:[#allocation5 + $0xc0] sm:$0xff]  ;;  %v65_v21 = vld [vmem:[#allocation5 + $0xb8] sm:$0xff] }
  0x20   :  { %179 = vmatpush3.msra.mxu0 %v55_v6  ;;  %v83_v18 = vrot.slane %v41_v16, %v82_v12  ;;  %v50_v20 = vld [vmem:[#allocation5 + $0x40] sm:$0xff]  ;;  %v49_v22 = vld [vmem:[#allocation5 + $0x38] sm:$0xff]  ;;  %v64_v23 = vld [vmem:[#allocation5 + $0xb0] sm:$0xff]  ;;  %v79_v38 = vrot.slane %v41_v16, %v78_v33  ;;  %p261_p13 = por %p260_p12, %p259_p11 }
  0x21   :  { %180 = vmatprep.subr.mxu0 %v70_v8  ;;  %v48_v24 = vld [vmem:[#allocation5 + $0x30] sm:$0xff]  ;;  %v63_v25 = vld [vmem:[#allocation5 + $0xa8] sm:$0xff]  ;;  %v62_v27 = vld [vmem:[#allocation5 + $0xa0] sm:$0xff] }
  0x22   :  { %181 = vmatpush3.msra.mxu0 %v54_v9  ;;  %150 = vmatprep.mubr.f32.mxu0 %v83_v18  ;;  %v47_v26 = vld [vmem:[#allocation5 + $0x28] sm:$0xff]  ;;  %v46_v28 = vld [vmem:[#allocation5 + $0x20] sm:$0xff]  ;;  %v61_v29 = vld [vmem:[#allocation5 + $0x98] sm:$0xff]  ;;  %p262_p0 = pnand %p261_p13, %p255_p10 }
  0x23   :  { %182 = vmatprep.subr.mxu0 %v69_v10  ;;  %v45_v30 = vld [vmem:[#allocation5 + $0x18] sm:$0xff]  ;;  %v60_v31 = vld [vmem:[#allocation5 + $0x90] sm:$0xff]  ;;  %v59_v34 = vld [vmem:[#allocation5 + $0x88] sm:$0xff] }
  0x24   :  { %183 = vmatpush3.msra.mxu0 %v53_v11  ;;  %v44_v32 = vld [vmem:[#allocation5 + $0x10] sm:$0xff]  ;;  %v43_v35 = vld [vmem:[#allocation5 + $0x8] sm:$0xff]  ;;  %v58_v36 = vld [vmem:[#allocation5 + $0x80] sm:$0xff] }
  0x25   :  { %184 = vmatprep.subr.mxu0 %v68_v13  ;;  %v42_v37 = vld [vmem:[#allocation5] sm:$0xff]  ;;  %v74_v40 = vld [vmem:[%s319_s2] sm:$0x1] }
  0x26   :  { %185 = vmatpush3.msra.mxu0 %v52_v14 }
  0x27   :  { %186 = vmatprep.subr.mxu0 %v67_v15 }
  0x28   :  { %187 = vmatpush3.msra.mxu0 %v51_v17 }
  0x29   :  { %188 = vmatprep.subr.mxu0 %v66_v19 }
  0x2a   :  { %189 = vmatpush3.msra.mxu0 %v50_v20 }
  0x2b   :  { %190 = vmatprep.subr.mxu0 %v65_v21 }
  0x2c   :  { %191 = vmatpush3.msra.mxu0 %v49_v22 }
  0x2d   :  { %192 = vmatprep.subr.mxu0 %v64_v23 }
  0x2e   :  { %193 = vmatpush3.msra.mxu0 %v48_v24 }
  0x2f   :  { %194 = vmatprep.subr.mxu0 %v63_v25 }
  0x30   :  { %195 = vmatpush3.msra.mxu0 %v47_v26 }
  0x31   :  { %196 = vmatprep.subr.mxu0 %v62_v27 }
  0x32   :  { %197 = vmatpush3.msra.mxu0 %v46_v28 }
  0x33   :  { %198 = vmatprep.subr.mxu0 %v61_v29 }
  0x34   :  { %199 = vmatpush3.msra.mxu0 %v45_v30 }
  0x35   :  { %200 = vmatprep.subr.mxu0 %v60_v31 }
  0x36   :  { %201 = vmatpush3.msra.mxu0 %v44_v32 }
  0x37   :  { %202 = vmatprep.subr.mxu0 %v59_v34 }
  0x38   :  { %203 = vmatpush3.msra.mxu0 %v43_v35 }
  0x39   :  { %204 = vmatprep.subr.mxu0 %v58_v36 }
  0x3a   :  { %205 = vmatpush3.msra.mxu0 %v42_v37 }
  0x3b   :  { %151 = vmatmul.mubr.f32.vlgmr.msra.gmra.mxu0 %v79_v38 }
  0xfb   :  { %v206_v39 = vpop.f32.mrf.mxu0 }
  0xfd   :  { %v207_v41 = vpop.f32.mrf.mxu0 }
  0xfe   :  { %v208_v42 = vadd.f32 %v207_v41, %v206_v39 }
 0x100   :  { %v153_v43 = vadd.f32 %v208_v42, %v74_v40 }
 0x102   :  { %v156_v44 = vmax.f32 %v153_v43, 0.0 }
 0x104   :  { %157 = vst [vmem:[#allocation7] sm:$0x1] %v156_v44 }
 0x105   :  { %265 = shalt.err (!%p262_p0)
}
 0x106   :  { %167 = dma.vmem_to_hbm [thread:$0]  %s165_s25, 16, %s320_s3, [#allocation4]  }
 0x107   :  { %278 = dma.done.wait [#allocation4], 16  }
 0x108   :  { %279 = vsyncadd [#allocation4], 4294967280 }
 0x109   :  { %171 = vsyncpa [#allocation3], 1 }
 0x10a   :  { %172 = vsyncpa [#allocation6], 1 }
 0x10b   :  { %173 = vsyncpa [#allocation4], 1 }

</bundles_post_ra>
